<compile_context>
chip_gen: v7x
topology: tpu7x:2x2x1
jax: 0.10.0
libtpu: 0.0.40
codegen_flags: <defaults>
</compile_context>

<pallas_src>
import functools

import jax
import jax.numpy as jnp
from jax import lax
from jax.experimental import pallas as pl
from jax.experimental.pallas import tpu as pltpu

# kornia rgb_to_yuv coefficients (bgr_to_yuv = rgb_to_yuv after a BGR->RGB flip).
_U_R, _U_G, _U_B = -0.147, -0.289, 0.436
_V_R, _V_G, _V_B = 0.615, -0.515, -0.100

_LANES = 128
_CHUNK_ELEMS = 256 * 128                 # target elems per in-register chunk (per channel)
_TARGET_BLOCK_BYTES = 6 * 1024 * 1024    # per-input per-step cap  (~24 MiB double-buffered)
_MIN_BLOCK_BYTES = 512 * 1024            # per-input per-step floor (keep DMA >> step overhead)
_MIN_STEPS = 8                           # aim for >= this many grid steps (pipelining / 2 TCs)
_VMEM_LIMIT = 32 * 1024 * 1024


def _round_down(v, m):
    return (v // m) * m


def _round_up(v, m):
    return -(-v // m) * m


def _yuv_uv_l1_kernel(x_ref, y_ref, out_ref, *, bh, cols, rows_total, n_rb, chunk_rows):
    """x_ref, y_ref: (1, 3, bh, cols) BGR blocks.  out_ref: (1, 1, 8, cols) partial sums."""

    def uv_abs(start, nrows):
        # nrows is static; start may be traced.
        sl = pl.ds(start, nrows)
        xb = x_ref[0, 0, sl, :].astype(jnp.float32)
        xg = x_ref[0, 1, sl, :].astype(jnp.float32)
        xr = x_ref[0, 2, sl, :].astype(jnp.float32)
        yb = y_ref[0, 0, sl, :].astype(jnp.float32)
        yg = y_ref[0, 1, sl, :].astype(jnp.float32)
        yr = y_ref[0, 2, sl, :].astype(jnp.float32)
        # Linearity: U(x) - U(y) == U(x - y); difference the BGR channels first.
        db = xb - yb
        dg = xg - yg
        dr = xr - yr
        du = _U_R * dr + _U_G * dg + _U_B * db
        dv = _V_R * dr + _V_G * dg + _V_B * db
        return jnp.abs(du) + jnp.abs(dv)                    # (nrows, cols)

    def corner(s):
        # Place a scalar at [0, 0] of an (8, cols) partial (odd-row-count fallback).
        ri = lax.broadcasted_iota(jnp.int32, (8, cols), 0)
        ci = lax.broadcasted_iota(jnp.int32, (8, cols), 1)
        return jnp.where((ri == 0) & (ci == 0), s, 0.0)

    def add_chunk(acc, start, nrows):
        a = uv_abs(start, nrows)
        if nrows % 8 == 0:
            # Sublane fold: pure vreg adds; the single cross-lane reduce is done by
            # the wrapper over the tiny partials array.
            return acc + a.reshape(nrows // 8, 8, cols).sum(axis=0)
        return acc + corner(jnp.sum(a))

    def compute(nrows):
        # Partial sum over the first `nrows` (static) rows of the block -> (8, cols).
        ch = min(chunk_rows, nrows)
        n_full = nrows // ch
        rem = nrows - n_full * ch
        acc = jnp.zeros((8, cols), jnp.float32)
        if n_full == 1:
            acc = add_chunk(acc, 0, ch)
        elif n_full > 1:
            def body(i, a):
                start = pl.multiple_of(i * ch, ch)
                return add_chunk(a, start, ch)
            acc = lax.fori_loop(0, n_full, body, acc,
                                unroll=True if n_full <= 16 else 8)
        if rem:
            acc = add_chunk(acc, n_full * ch, rem)
        return acc

    if rows_total % bh == 0:
        out_ref[0, 0, :, :] = compute(bh)
    else:
        # Ragged last row-block: only the final grid step pays for the short slice;
        # every other step runs the unmasked hot path.
        j = pl.program_id(1)
        last = n_rb - 1
        valid_last = rows_total - last * bh

        @pl.when(j != last)
        def _():
            out_ref[0, 0, :, :] = compute(bh)

        @pl.when(j == last)
        def _():
            out_ref[0, 0, :, :] = compute(valid_last)


@functools.partial(jax.jit, static_argnames=("block_rows", "chunk_rows"))
def yuv_loss(x, y, *, block_rows=4096, chunk_rows=None):
    """x, y: (N, 3, H, W) BGR images (NCHW).  Returns mean L1 over the U, V channels of
    kornia.bgr_to_yuv(x) vs kornia.bgr_to_yuv(y)  (== nn.L1Loss default 'mean')."""
    N, C, H, W = x.shape
    assert C == 3, "YUVLoss expects 3-channel BGR input"
    assert y.shape == x.shape
    HW = H * W
    itemsize = jnp.dtype(x.dtype).itemsize
    sub = max(8, 32 // itemsize)             # sublane granularity: f32->8, bf16->16, int8->32

    # Pick a lane-dense 2-D pixel view:
    #   * HW % 128 == 0 : flatten to (N, 3, HW//128, 128)   (free reshape, fully dense)
    #   * otherwise     : keep native (N, 3, H, W); no HBM pad copy -- the lane padding
    #                     beyond W exists only in the VMEM layout and never enters sums.
    if HW % _LANES == 0:
        rows_total, cols = HW // _LANES, _LANES
        xv = x.reshape(N, 3, rows_total, cols)
        yv = y.reshape(N, 3, rows_total, cols)
    else:
        rows_total, cols = H, W
        xv, yv = x, y
    cols_lanes = _round_up(cols, _LANES)
    row_bytes = 3 * cols_lanes * itemsize    # VMEM bytes per block row (both U/V channels)

    # Chunk rows: keep per-chunk intermediates vreg-sized (~32K elems per channel).
    if chunk_rows is None:
        ch = max(sub, _round_down(_CHUNK_ELEMS // cols_lanes, sub))
    else:
        ch = max(sub, _round_down(int(chunk_rows), sub))

    # Block rows: largest block that (a) fits the VMEM budget, (b) respects the user cap,
    # and (c) leaves ~_MIN_STEPS grid steps for pipelining and both v7x TensorCores,
    # without dropping below a per-step DMA floor.
    bh_vmem = max(sub, _round_down(_TARGET_BLOCK_BYTES // row_bytes, sub))
    bh_user = max(sub, _round_down(int(block_rows), sub))
    bh_floor = max(sub, _round_down(_MIN_BLOCK_BYTES // row_bytes, sub))
    k = -(-_MIN_STEPS // N)                                  # grid steps wanted per image
    bh_pipe = max(bh_floor, _round_up(-(-rows_total // k), sub))
    bh = min(bh_vmem, bh_user, bh_pipe)
    if bh >= rows_total:
        bh = rows_total                                      # full-extent block (always legal)
    n_rb = -(-rows_total // bh)

    kernel = functools.partial(
        _yuv_uv_l1_kernel,
        bh=bh, cols=cols, rows_total=rows_total, n_rb=n_rb, chunk_rows=ch)

    cost = pl.CostEstimate(
        flops=16 * N * HW,
        transcendentals=0,
        bytes_accessed=2 * N * 3 * HW * itemsize + N * n_rb * 8 * cols * 4,
    )

    partials = pl.pallas_call(
        kernel,
        out_shape=jax.ShapeDtypeStruct((N, n_rb, 8, cols), jnp.float32),
        grid=(N, n_rb),
        in_specs=[
            pl.BlockSpec((1, 3, bh, cols), lambda n, j: (n, 0, j, 0)),
            pl.BlockSpec((1, 3, bh, cols), lambda n, j: (n, 0, j, 0)),
        ],
        out_specs=pl.BlockSpec((1, 1, 8, cols), lambda n, j: (n, j, 0, 0)),
        compiler_params=pltpu.CompilerParams(
            dimension_semantics=("parallel", "parallel"),
            vmem_limit_bytes=_VMEM_LIMIT,
        ),
        cost_estimate=cost,
    )(xv, yv)

    # nn.L1Loss() default reduction='mean' over the (N, 2, H, W) U/V slab.
    return jnp.sum(partials) / jnp.float32(N * 2 * H * W)


def _reference_yuv_loss(x, y):
    """Pure-JAX reference matching kornia.bgr_to_yuv + L1 on channels 1:."""
    def bgr_to_yuv_uv(img):
        b, g, r = img[:, 0], img[:, 1], img[:, 2]
        u = _U_R * r + _U_G * g + _U_B * b
        v = _V_R * r + _V_G * g + _V_B * b
        return jnp.stack([u, v], axis=1)
    return jnp.mean(jnp.abs(bgr_to_yuv_uv(x) - bgr_to_yuv_uv(y)))


if __name__ == "__main__":
    key = jax.random.PRNGKey(0)

    def check(shape, **kw):
        k1, k2 = jax.random.split(jax.random.fold_in(key, sum(shape)))
        x = jax.random.uniform(k1, shape, dtype=jnp.float32)
        y = jax.random.uniform(k2, shape, dtype=jnp.float32)
        out = jax.block_until_ready(yuv_loss(x, y, **kw))
        ref = _reference_yuv_loss(x, y)
        assert jnp.allclose(out, ref, rtol=1e-5, atol=1e-6), (shape, float(out), float(ref))

    check((2, 3, 16, 16))                                # primary: tiny full-extent block
    check((1, 3, 64, 32))                                # dense flattened view, sublane fold
    check((1, 3, 48, 40))                                # odd row count (corner fallback)
    check((1, 3, 72, 128), block_rows=32, chunk_rows=8)  # chunked fori_loop + ragged pl.when
    check((2, 3, 17, 19))                                # HW % 128 != 0 -> native NCHW (no pad)
    check((1, 3, 224, 224))                              # multi-step grid + ragged last block
    print("KERNEL_OK")
</pallas_src>

<mosaic_0001>
module attributes {stable_mosaic.version = 11 : i64} {
  func.func @_yuv_uv_l1_kernel(%arg0: i32, %arg1: i32, %arg2: memref<1x3x2x128xf32, #tpu.memory_space<vmem>>, %arg3: memref<1x3x2x128xf32, #tpu.memory_space<vmem>>, %arg4: memref<1x1x8x128xf32, #tpu.memory_space<vmem>>) attributes {dimension_semantics = [#tpu.dimension_semantics<parallel>, #tpu.dimension_semantics<parallel>], iteration_bounds = array<i64: 2, 1>, scalar_prefetch = 0 : i64, scratch_operands = 0 : i64, tpu.core_type = #tpu.core_type<tc>, window_params = [{transform_indices = @transform_0, window_bounds = array<i64: 1, 3, 2, 128>}, {transform_indices = @transform_1, window_bounds = array<i64: 1, 3, 2, 128>}, {transform_indices = @transform_2, window_bounds = array<i64: 1, 1, 8, 128>}]} {
    %cst = arith.constant 0.000000e+00 : f32
    %0 = vector.broadcast %cst : f32 to vector<8x128xf32>
    %c0 = arith.constant 0 : index
    %c0_0 = arith.constant 0 : index
    %c0_1 = arith.constant 0 : index
    %c0_2 = arith.constant 0 : index
    %1 = vector.load %arg2[%c0, %c0_0, %c0_1, %c0_2] : memref<1x3x2x128xf32, #tpu.memory_space<vmem>>, vector<1x1x2x128xf32>
    %2 = vector.shape_cast %1 : vector<1x1x2x128xf32> to vector<2x128xf32>
    %c0_3 = arith.constant 0 : index
    %c1 = arith.constant 1 : index
    %c0_4 = arith.constant 0 : index
    %c0_5 = arith.constant 0 : index
    %3 = vector.load %arg2[%c0_3, %c1, %c0_4, %c0_5] : memref<1x3x2x128xf32, #tpu.memory_space<vmem>>, vector<1x1x2x128xf32>
    %4 = vector.shape_cast %3 : vector<1x1x2x128xf32> to vector<2x128xf32>
    %c0_6 = arith.constant 0 : index
    %c2 = arith.constant 2 : index
    %c0_7 = arith.constant 0 : index
    %c0_8 = arith.constant 0 : index
    %5 = vector.load %arg2[%c0_6, %c2, %c0_7, %c0_8] : memref<1x3x2x128xf32, #tpu.memory_space<vmem>>, vector<1x1x2x128xf32>
    %6 = vector.shape_cast %5 : vector<1x1x2x128xf32> to vector<2x128xf32>
    %c0_9 = arith.constant 0 : index
    %c0_10 = arith.constant 0 : index
    %c0_11 = arith.constant 0 : index
    %c0_12 = arith.constant 0 : index
    %7 = vector.load %arg3[%c0_9, %c0_10, %c0_11, %c0_12] : memref<1x3x2x128xf32, #tpu.memory_space<vmem>>, vector<1x1x2x128xf32>
    %8 = vector.shape_cast %7 : vector<1x1x2x128xf32> to vector<2x128xf32>
    %c0_13 = arith.constant 0 : index
    %c1_14 = arith.constant 1 : index
    %c0_15 = arith.constant 0 : index
    %c0_16 = arith.constant 0 : index
    %9 = vector.load %arg3[%c0_13, %c1_14, %c0_15, %c0_16] : memref<1x3x2x128xf32, #tpu.memory_space<vmem>>, vector<1x1x2x128xf32>
    %10 = vector.shape_cast %9 : vector<1x1x2x128xf32> to vector<2x128xf32>
    %c0_17 = arith.constant 0 : index
    %c2_18 = arith.constant 2 : index
    %c0_19 = arith.constant 0 : index
    %c0_20 = arith.constant 0 : index
    %11 = vector.load %arg3[%c0_17, %c2_18, %c0_19, %c0_20] : memref<1x3x2x128xf32, #tpu.memory_space<vmem>>, vector<1x1x2x128xf32>
    %12 = vector.shape_cast %11 : vector<1x1x2x128xf32> to vector<2x128xf32>
    %13 = arith.subf %2, %8 : vector<2x128xf32>
    %14 = arith.subf %4, %10 : vector<2x128xf32>
    %15 = arith.subf %6, %12 : vector<2x128xf32>
    %cst_21 = arith.constant -1.470000e-01 : f32
    %16 = vector.broadcast %cst_21 : f32 to vector<2x128xf32>
    %17 = arith.mulf %16, %15 : vector<2x128xf32>
    %cst_22 = arith.constant -2.890000e-01 : f32
    %18 = vector.broadcast %cst_22 : f32 to vector<2x128xf32>
    %19 = arith.mulf %18, %14 : vector<2x128xf32>
    %20 = arith.addf %17, %19 : vector<2x128xf32>
    %cst_23 = arith.constant 4.360000e-01 : f32
    %21 = vector.broadcast %cst_23 : f32 to vector<2x128xf32>
    %22 = arith.mulf %21, %13 : vector<2x128xf32>
    %23 = arith.addf %20, %22 : vector<2x128xf32>
    %cst_24 = arith.constant 6.150000e-01 : f32
    %24 = vector.broadcast %cst_24 : f32 to vector<2x128xf32>
    %25 = arith.mulf %24, %15 : vector<2x128xf32>
    %cst_25 = arith.constant -5.150000e-01 : f32
    %26 = vector.broadcast %cst_25 : f32 to vector<2x128xf32>
    %27 = arith.mulf %26, %14 : vector<2x128xf32>
    %28 = arith.addf %25, %27 : vector<2x128xf32>
    %cst_26 = arith.constant -1.000000e-01 : f32
    %29 = vector.broadcast %cst_26 : f32 to vector<2x128xf32>
    %30 = arith.mulf %29, %13 : vector<2x128xf32>
    %31 = arith.addf %28, %30 : vector<2x128xf32>
    %32 = math.absf %23 : vector<2x128xf32>
    %33 = math.absf %31 : vector<2x128xf32>
    %34 = arith.addf %32, %33 : vector<2x128xf32>
    %35 = vector.shape_cast %34 : vector<2x128xf32> to vector<1x2x128xf32>
    %cst_27 = arith.constant dense<0.000000e+00> : vector<1xf32>
    %36 = vector.multi_reduction <add>, %35, %cst_27 [1, 2] : vector<1x2x128xf32> to vector<1xf32>
    %37 = vector.shape_cast %36 : vector<1xf32> to vector<1x1x1xf32>
    %38 = vector.extract %37[0, 0, 0] : f32 from vector<1x1x1xf32>
    %39 = tpu.iota {dimensions = array<i32: 0>} : vector<8x128xi32>
    %40 = tpu.iota {dimensions = array<i32: 1>} : vector<8x128xi32>
    %c0_i32 = arith.constant 0 : i32
    %41 = vector.broadcast %c0_i32 : i32 to vector<8x128xi32>
    %42 = arith.cmpi eq, %39, %41 : vector<8x128xi32>
    %c0_i32_28 = arith.constant 0 : i32
    %43 = vector.broadcast %c0_i32_28 : i32 to vector<8x128xi32>
    %44 = arith.cmpi eq, %40, %43 : vector<8x128xi32>
    %45 = arith.andi %42, %44 : vector<8x128xi1>
    %cst_29 = arith.constant 0.000000e+00 : f32
    %46 = vector.broadcast %38 : f32 to vector<8x128xf32>
    %47 = vector.broadcast %cst_29 : f32 to vector<8x128xf32>
    %48 = arith.select %45, %46, %47 : vector<8x128xi1>, vector<8x128xf32>
    %49 = arith.addf %0, %48 : vector<8x128xf32>
    %c0_30 = arith.constant 0 : index
    %c0_31 = arith.constant 0 : index
    %c0_32 = arith.constant 0 : index
    %c0_33 = arith.constant 0 : index
    %50 = vector.load %arg4[%c0_30, %c0_31, %c0_32, %c0_33] : memref<1x1x8x128xf32, #tpu.memory_space<vmem>>, vector<1x1x8x128xf32>
    %51 = vector.shape_cast %50 : vector<1x1x8x128xf32> to vector<8x128xf32>
    %52 = vector.shape_cast %49 : vector<8x128xf32> to vector<1x1x8x128xf32>
    tpu.vector_store %arg4[%c0_30, %c0_31, %c0_32, %c0_33], %52 {strides = array<i32>} : memref<1x1x8x128xf32, #tpu.memory_space<vmem>>, vector<1x1x8x128xf32>,
    return
  }
  func.func @transform_0(%arg0: i32, %arg1: i32) -> (i32, i32, i32, i32) {
    %c0_i32 = arith.constant 0 : i32
    %c0_i32_0 = arith.constant 0 : i32
    %c0_i32_1 = arith.constant 0 : i32
    return %arg0, %c0_i32, %arg1, %c0_i32_0 : i32, i32, i32, i32
  }
  func.func @transform_1(%arg0: i32, %arg1: i32) -> (i32, i32, i32, i32) {
    %c0_i32 = arith.constant 0 : i32
    %c0_i32_0 = arith.constant 0 : i32
    %c0_i32_1 = arith.constant 0 : i32
    return %arg0, %c0_i32, %arg1, %c0_i32_0 : i32, i32, i32, i32
  }
  func.func @transform_2(%arg0: i32, %arg1: i32) -> (i32, i32, i32, i32) {
    %c0_i32 = arith.constant 0 : i32
    %c0_i32_0 = arith.constant 0 : i32
    %c0_i32_1 = arith.constant 0 : i32
    return %arg0, %arg1, %c0_i32, %c0_i32_0 : i32, i32, i32, i32
  }
}

</mosaic_0001>

<bundles_post_ra>
// kernel: yuv_loss.1
= control target key start
LH: loop header
LB: loop body
LE: loop exit
PB: predicated region body
PF: predicated region fallthrough
CT: control target
= control target key end

     0   :  { %s427_s9 = smov 0   ;;  %s429_s10 = smov 0   ;;  %s467_s0 = inlined_call_operand.vmem [shape: f32[2,3,2,128], index: 0, kind: input, shape index: {}]   ;;  %s468_s1 = inlined_call_operand.vmem [shape: f32[2,3,2,128], index: 1, kind: input, shape index: {}]   ;;  %s469_s2 = inlined_call_operand.vmem [shape: f32[2,1,8,128], index: 2, kind: output, shape index: {}]  }
   0x1   :  { %s431_s11 = smov 0  }
   0x2 LB: > { %s24_s12 = sadd.s32 1, %s406_s10  ;;  %p351_p0 = scmp.ge.s32.totalorder %s410_s11, 1  ;;  %s410_s11 = sphi %s431_s11, %s12_s11   ;;  %s406_s10 = sphi %s429_s10, %s471_s10   ;;  %s402_s9 = sphi %s427_s9, %s470_s9  }
   0x3   : > { %p26_p1 = scmp.ge.s32.totalorder %s24_s12, 2  ;;  %p146_p2 = scmp.lt.s32.totalorder %s410_s11, 3 }
   0x5   : > { %s473_s12 = smov (%p26_p1, %s24_s12), 0  ;;  %p147_p3 = pnand %p351_p0, %p146_p2 }
   0x6   : > { %p181_p4 = scmp.lt.s32.totalorder (!%p147_p3), %s402_s9, 1  ;;  %vm230_vm0 = vcmask (!%p147_p3), 1041408   ;;  %v241_v30 = vlaneseq (!%p147_p3) }
   0x7   : > { %150 = sbr.rel (%p147_p3) target bundleno = 241 (0xf1), region = 28 }
   0x8   : > { %v242_v31 = vshrl.u32 (!%p147_p3), %v241_v30, 7  ;;  %v244_v32 = vand.u32 (!%p147_p3), 127, %v241_v30 }
   0xa   : > { %vm245_vm1 = vcmp.eq.s32.totalorder (!%p147_p3), %v242_v31, 0  ;;  %vm246_vm2 = vcmp.eq.s32.totalorder (!%p147_p3), %v244_v32, 0 }
   0xb   : > { %vm247_vm3 = vmand (!%p147_p3), %vm245_vm1, %vm246_vm2 }
   0xe   : > { %s475_s9 = smov (!%p181_p4, %s402_s9), 1 }
   0xf   : > { %s361_s13 = smul.u32 6, %s475_s9  ;;  %s354_s20 = sshll.u32 %s475_s9, 3 }
  0x10   : > { %s203_s23 = scalar_lea.vmem %s469_s2, %s354_s20 }
  0x11   : > { %s188_s16 = scalar_lea.vmem %s467_s0, %s361_s13  ;;  %s196_s19 = scalar_lea.vmem %s468_s1, %s361_s13 }
  0x12   : > { %v204_v0 = vld [vmem:[%s188_s16] sm:$0x3]  ;;  %v355_v1 = vld [vmem:[%s188_s16 + $0x2] sm:$0x3]  ;;  %v356_v2 = vld [vmem:[%s188_s16 + $0x4] sm:$0x3] }
  0x13   : > { %v209_v3 = vld [vmem:[%s196_s19] sm:$0x3]  ;;  %v357_v4 = vld [vmem:[%s196_s19 + $0x2] sm:$0x3]  ;;  %v358_v5 = vld [vmem:[%s196_s19 + $0x4] sm:$0x3] }
  0x14   : > { %v214_v6 = vsub.f32 %v204_v0, %v209_v3  ;;  %v215_v7 = vsub.f32 %v355_v1, %v357_v4  ;;  %v216_v8 = vsub.f32 %v356_v2, %v358_v5 }
  0x16   : > { %v217_v9 = vmul.f32 -0.147, %v216_v8  ;;  %v218_v10 = vmul.f32 -0.289, %v215_v7  ;;  %v220_v11 = vmul.f32 0.436, %v214_v6 }
  0x17   : > { %v222_v12 = vmul.f32 0.615, %v216_v8  ;;  %v223_v13 = vmul.f32 -0.515, %v215_v7  ;;  %v225_v14 = vmul.f32 -0.1, %v214_v6 }
  0x18   : > { %v219_v15 = vadd.f32 %v218_v10, %v217_v9 }
  0x19   : > { %v224_v16 = vadd.f32 %v223_v13, %v222_v12 }
  0x1a   : > { %v221_v17 = vadd.f32 %v220_v11, %v219_v15 }
  0x1b   : > { %v226_v18 = vadd.f32 %v225_v14, %v224_v16 }
  0x1c   : > { %v227_v19 = vand.u32 2147483647, %v221_v17 }
  0x1d   : > { %v228_v20 = vand.u32 2147483647, %v226_v18 }
  0x1f   : > { %v229_v21 = vadd.f32 %v228_v20, %v227_v19 }
  0x21   : > { %v231_v22 = vsel %vm230_vm0, %v229_v21, 0.0 }
  0x22   : > { %232 = vadd.xlane.f32.xlu0 %v231_v22 }
  0xaf   : > { %v233_v23 = vpop.xlane.xlu0 %232 }
  0xb0   : > { %v234_v24 = vrot.slane %v233_v23, 4 }
  0xb2   : > { %v235_v25 = vadd.f32 %v234_v24, %v233_v23 }
  0xb4   : > { %v236_v26 = vrot.slane %v235_v25, 2 }
  0xb6   : > { %v237_v27 = vadd.f32 %v236_v26, %v235_v25 }
  0xb8   : > { %v238_v28 = vrot.slane %v237_v27, 1 }
  0xba   : > { %v239_v29 = vadd.f32 %v238_v28, %v237_v27 }
  0xbc   : > { %362 = vpush %v239_v29 }
  0xed   : > { %s363_s24 = spop %362 }
  0xee   : > { %v248_v33 = vstv %s363_s24 }
  0xef   : > { %v249_v34 = vsel %vm247_vm3, %v248_v33, 0.0 }
  0xf0   : > { %251 = vst [vmem:[%s203_s23] sm:$0xff] %v249_v34 }
  0xf1 PF: > { %s12_s11 = sadd.s32 1, %s410_s11   ;;  %s470_s9 = smov %s406_s10 }
  0xf2   : > { %p9_p5 = scmp.ge.s32.totalorder %s12_s11, 4   ;;  %s471_s10 = smov %s473_s12 }
  0xf4   :  { %11 = sbr.rel (!%p9_p5) target bundleno = 2 (0x2), region = 65 }

</bundles_post_ra>
